<compile_context>
chip_gen: v5e
topology: v5e:2x2
jax: 0.10.0
libtpu: 0.0.40
codegen_flags: <defaults>
</compile_context>

<pallas_src>
import functools

import jax
import jax.numpy as jnp
from jax.experimental import pallas as pl
from jax.experimental.pallas import tpu as pltpu


def _focal_loss_kernel(x_ref, tgt_ref, *rest, gamma, n_total, tile_n, has_weight):
    if has_weight:
        w_ref, out_ref = rest
    else:
        w_ref = None
        (out_ref,) = rest

    tgt = tgt_ref[...]                                   # (tile_n, 1) int32
    tn = tgt.shape[0]
    c = x_ref.shape[-1]

    # Validity of each row in the (possibly padded) last tile.
    row0 = pl.program_id(0) * tile_n
    row_ids = row0 + jax.lax.broadcasted_iota(jnp.int32, (tn, 1), 0)
    valid = row_ids < n_total                            # (tile_n, 1) bool

    # Row max on the native dtype (exact for bf16); the f32 cast is fused into
    # the single full-size `shifted` temporary (no standing f32 copy).
    x = x_ref[...]                                       # (tile_n, C) native dtype
    m = jnp.max(x, axis=-1, keepdims=True).astype(jnp.float32)      # (tile_n, 1)
    shifted = x.astype(jnp.float32) - m                              # (tile_n, C) f32
    lse = jnp.log(jnp.sum(jnp.exp(shifted), axis=-1, keepdims=True))  # (tile_n, 1)

    # One-hot of the target via broadcast compare against a (1, C) iota.
    ids_row = jax.lax.broadcasted_iota(jnp.int32, (1, c), 1)         # (1, C)
    onehot = ids_row == tgt                                          # (tile_n, C) bool
    shifted_t = jnp.sum(jnp.where(onehot, shifted, 0.0),
                        axis=-1, keepdims=True)                      # (tile_n, 1)

    # Focal term only on the (tile_n, 1) picked vector.
    log_p_t = shifted_t - lse                            # log_softmax at target
    p_t = jnp.exp(log_p_t)
    # Clamp guards the pow path against p_t marginally > 1 from rounding
    # (deliberate, negligible deviation from PyTorch).
    omp = jnp.maximum(1.0 - p_t, 0.0)

    g = float(gamma)
    if g == int(g) and int(g) >= 0:                      # integer gamma -> VPU multiplies
        gi = int(g)
        mod = jnp.ones_like(omp) if gi == 0 else omp
        for _ in range(max(gi - 1, 0)):
            mod = mod * omp
    else:                                                # generic gamma -> pow on (tile_n, 1)
        mod = omp ** g
    # jnp.where (not multiply-by-mask): garbage/NaN in padded rows must not
    # poison the sums via 0*NaN.
    focal_t = jnp.where(valid, mod * log_p_t, 0.0)       # (tile_n, 1)

    if has_weight:
        # Gather w[target] on the idle MXU: onehot(tile_n, C) @ w(C, 1).
        w_t = jnp.dot(onehot.astype(jnp.float32), w_ref[...],
                      precision=jax.lax.Precision.HIGHEST,
                      preferred_element_type=jnp.float32)            # (tile_n, 1)
        w_t = jnp.where(valid, w_t, 0.0)
        num = jnp.sum(w_t * focal_t)
        den = jnp.sum(w_t)
    else:                                                # weight=None: den = row count
        num = jnp.sum(focal_t)
        den = jnp.sum(valid.astype(jnp.float32))

    out_ref[0, 0] = -num
    out_ref[0, 1] = den


def _vmem_capacity_bytes():
    """Physical per-core VMEM; conservative v7x fallback if the query fails."""
    try:
        return int(pltpu.get_tpu_info().vmem_capacity_bytes)
    except Exception:
        return 64 * 1024 * 1024


def focal_loss(logits, targets, weight=None, gamma=2.0, tile_n=None):
    """logits: (N, C) float (any dtype); targets: (N,) int; weight: optional (C,)."""
    n, c = logits.shape
    itemsize = jnp.dtype(logits.dtype).itemsize
    sub = max(8, 32 // itemsize)                  # sublane packing: f32->8, bf16->16

    vmem_cap = _vmem_capacity_bytes()
    # Scoped VMEM limit: 3/4 of physical (48 MiB on v7x, 96 MiB on v5e/v6e).
    vmem_limit = int(min((vmem_cap * 3) // 4, 112 * 1024 * 1024))

    if tile_n is None:
        # Per-row VMEM footprint: double-buffered native tile + ~3 full-width
        # f32 temporaries (shifted, exp, onehot-as-f32).  Use half the scoped
        # limit so outputs / pipelining keep headroom.
        per_row = c * (2 * itemsize + 3 * 4)
        tile_n = (vmem_limit // 2) // max(per_row, 1)
        tile_n = max(sub, min(tile_n, 8192))
    tile_n = min(int(tile_n), n)
    if tile_n < n:
        tile_n = max(sub, (tile_n // sub) * sub)
    grid = pl.cdiv(n, tile_n)

    tgt = jnp.asarray(targets, jnp.int32).reshape(n, 1)
    has_weight = weight is not None

    kernel = functools.partial(
        _focal_loss_kernel, gamma=gamma, n_total=n, tile_n=tile_n,
        has_weight=has_weight)

    in_specs = [
        pl.BlockSpec((tile_n, c), lambda i: (i, 0)),     # logits, native dtype
        pl.BlockSpec((tile_n, 1), lambda i: (i, 0)),     # targets
    ]
    args = [logits, tgt]
    if has_weight:
        # (C, 1) layout so the in-kernel gather is a plain (M,K)x(K,1) MXU matmul.
        in_specs.append(pl.BlockSpec((c, 1), lambda i: (0, 0)))
        args.append(jnp.asarray(weight, jnp.float32).reshape(c, 1))

    parts = pl.pallas_call(
        kernel,
        grid=(grid,),
        out_shape=jax.ShapeDtypeStruct((grid, 2), jnp.float32),
        in_specs=in_specs,
        out_specs=pl.BlockSpec((1, 2), lambda i: (i, 0), memory_space=pltpu.SMEM),
        compiler_params=pltpu.CompilerParams(
            dimension_semantics=("parallel",),           # megacore-shardable
            vmem_limit_bytes=vmem_limit),
        # TODO(synk): on 128 MiB parts, pipeline_mode=pl.Buffered(3) on the
        # logits spec can hide DMA issue latency for a few extra percent.
    )(*args)

    # Tiny final reduction + divide in plain JAX (num in lane 0, den in lane 1).
    return jnp.sum(parts[:, 0]) / jnp.sum(parts[:, 1])


def _focal_loss_ref(logits, targets, weight=None, gamma=2.0):
    """Pure-JAX reference for sanity checking."""
    n, c = logits.shape
    if weight is None:
        weight = jnp.ones((c,), jnp.float32)
    log_prob = jax.nn.log_softmax(logits.astype(jnp.float32), axis=-1)
    prob = jnp.exp(log_prob)
    focal = ((1.0 - prob) ** gamma) * log_prob
    picked = focal[jnp.arange(n), targets]
    w_picked = jnp.asarray(weight, jnp.float32)[targets]
    return -jnp.sum(w_picked * picked) / jnp.sum(w_picked)


if __name__ == "__main__":
    key = jax.random.PRNGKey(0)
    k1, k2, k3, k4, k5 = jax.random.split(key, 5)

    # Case 1: unweighted, default integer gamma, single tile, f32 logits.
    N1, C1 = 8, 32
    logits1 = jax.random.normal(k1, (N1, C1), dtype=jnp.float32)
    targets1 = jax.random.randint(k2, (N1,), 0, C1, dtype=jnp.int32)
    out1 = jax.block_until_ready(focal_loss(logits1, targets1, gamma=2.0))
    ref1 = _focal_loss_ref(logits1, targets1, gamma=2.0)
    assert jnp.allclose(out1, ref1, atol=1e-5, rtol=1e-5), (out1, ref1)

    # Case 2: weighted, bf16 logits passed through, multi-tile grid with a
    # padded last tile (N=20, tile_n=16 -> grid=2).
    N2, C2 = 20, 48
    logits2 = jax.random.normal(k3, (N2, C2), dtype=jnp.float32).astype(jnp.bfloat16)
    targets2 = jax.random.randint(k4, (N2,), 0, C2, dtype=jnp.int32)
    weight2 = jax.random.uniform(k5, (C2,), dtype=jnp.float32) + 0.5
    out2 = jax.block_until_ready(
        focal_loss(logits2, targets2, weight=weight2, gamma=2.0, tile_n=16))
    ref2 = _focal_loss_ref(logits2.astype(jnp.float32), targets2,
                           weight=weight2, gamma=2.0)
    assert jnp.allclose(out2, ref2, atol=1e-4, rtol=1e-4), (out2, ref2)

    # Case 3: non-integer gamma exercises the pow path (still only on (N, 1)).
    out3 = jax.block_until_ready(focal_loss(logits1, targets1, gamma=1.5))
    ref3 = _focal_loss_ref(logits1, targets1, gamma=1.5)
    assert jnp.allclose(out3, ref3, atol=1e-5, rtol=1e-5), (out3, ref3)

    print("KERNEL_OK")
</pallas_src>

<mosaic_0001>
module attributes {stable_mosaic.version = 11 : i64} {
  func.func @_focal_loss_kernel(%arg0: i32, %arg1: memref<8x32xf32, #tpu.memory_space<vmem>>, %arg2: memref<8x1xi32, #tpu.memory_space<vmem>>, %arg3: memref<1x2xf32, #tpu.memory_space<smem>>) attributes {dimension_semantics = [#tpu.dimension_semantics<parallel>], iteration_bounds = array<i64: 1>, scalar_prefetch = 0 : i64, scratch_operands = 0 : i64, tpu.core_type = #tpu.core_type<tc>, window_params = [{transform_indices = @transform_0, window_bounds = array<i64: 8, 32>}, {transform_indices = @transform_1, window_bounds = array<i64: 8, 1>}, {transform_indices = @transform_2, window_bounds = array<i64: 1, 2>}]} {
    %c0 = arith.constant 0 : index
    %c0_0 = arith.constant 0 : index
    %0 = vector.load %arg2[%c0, %c0_0] : memref<8x1xi32, #tpu.memory_space<vmem>>, vector<8x1xi32>
    %c8_i32 = arith.constant 8 : i32
    %1 = arith.muli %arg0, %c8_i32 : i32
    %2 = tpu.iota {dimensions = array<i32: 0>} : vector<8x1xi32>
    %3 = vector.broadcast %1 : i32 to vector<8x1xi32>
    %4 = arith.addi %3, %2 : vector<8x1xi32>
    %c8_i32_1 = arith.constant 8 : i32
    %5 = vector.broadcast %c8_i32_1 : i32 to vector<8x1xi32>
    %6 = arith.cmpi slt, %4, %5 : vector<8x1xi32>
    %c0_2 = arith.constant 0 : index
    %c0_3 = arith.constant 0 : index
    %7 = vector.load %arg1[%c0_2, %c0_3] : memref<8x32xf32, #tpu.memory_space<vmem>>, vector<8x32xf32>
    %cst = arith.constant dense<0xFF800000> : vector<8xf32>
    %8 = vector.multi_reduction <maximumf>, %7, %cst [1] : vector<8x32xf32> to vector<8xf32>
    %9 = vector.shape_cast %8 : vector<8xf32> to vector<8x1xf32>
    %10 = vector.broadcast %9 : vector<8x1xf32> to vector<8x32xf32>
    %11 = arith.subf %7, %10 : vector<8x32xf32>
    %12 = math.exp %11 : vector<8x32xf32>
    %cst_4 = arith.constant dense<0.000000e+00> : vector<8xf32>
    %13 = vector.multi_reduction <add>, %12, %cst_4 [1] : vector<8x32xf32> to vector<8xf32>
    %14 = vector.shape_cast %13 : vector<8xf32> to vector<8x1xf32>
    %15 = math.log %14 : vector<8x1xf32>
    %16 = tpu.iota {dimensions = array<i32: 1>} : vector<1x32xi32>
    %17 = vector.broadcast %16 : vector<1x32xi32> to vector<8x32xi32>
    %18 = vector.broadcast %0 : vector<8x1xi32> to vector<8x32xi32>
    %19 = arith.cmpi eq, %17, %18 : vector<8x32xi32>
    %cst_5 = arith.constant 0.000000e+00 : f32
    %20 = vector.broadcast %cst_5 : f32 to vector<8x32xf32>
    %21 = arith.select %19, %11, %20 : vector<8x32xi1>, vector<8x32xf32>
    %cst_6 = arith.constant dense<0.000000e+00> : vector<8xf32>
    %22 = vector.multi_reduction <add>, %21, %cst_6 [1] : vector<8x32xf32> to vector<8xf32>
    %23 = vector.shape_cast %22 : vector<8xf32> to vector<8x1xf32>
    %24 = arith.subf %23, %15 : vector<8x1xf32>
    %25 = math.exp %24 : vector<8x1xf32>
    %cst_7 = arith.constant 1.000000e+00 : f32
    %26 = vector.broadcast %cst_7 : f32 to vector<8x1xf32>
    %27 = arith.subf %26, %25 : vector<8x1xf32>
    %cst_8 = arith.constant 0.000000e+00 : f32
    %28 = vector.broadcast %cst_8 : f32 to vector<8x1xf32>
    %29 = arith.maximumf %27, %28 : vector<8x1xf32>
    %30 = arith.mulf %29, %29 : vector<8x1xf32>
    %31 = arith.mulf %30, %24 : vector<8x1xf32>
    %cst_9 = arith.constant 0.000000e+00 : f32
    %32 = vector.broadcast %cst_9 : f32 to vector<8x1xf32>
    %33 = arith.select %6, %31, %32 : vector<8x1xi1>, vector<8x1xf32>
    %34 = vector.shape_cast %33 : vector<8x1xf32> to vector<1x8x1xf32>
    %cst_10 = arith.constant dense<0.000000e+00> : vector<1xf32>
    %35 = vector.multi_reduction <add>, %34, %cst_10 [1, 2] : vector<1x8x1xf32> to vector<1xf32>
    %36 = vector.shape_cast %35 : vector<1xf32> to vector<1x1x1xf32>
    %37 = vector.extract %36[0, 0, 0] : f32 from vector<1x1x1xf32>
    %38 = arith.extui %6 : vector<8x1xi1> to vector<8x1xi32>
    %39 = arith.sitofp %38 : vector<8x1xi32> to vector<8x1xf32>
    %40 = vector.shape_cast %39 : vector<8x1xf32> to vector<1x8x1xf32>
    %cst_11 = arith.constant dense<0.000000e+00> : vector<1xf32>
    %41 = vector.multi_reduction <add>, %40, %cst_11 [1, 2] : vector<1x8x1xf32> to vector<1xf32>
    %42 = vector.shape_cast %41 : vector<1xf32> to vector<1x1x1xf32>
    %43 = vector.extract %42[0, 0, 0] : f32 from vector<1x1x1xf32>
    %cst_12 = arith.constant 0.000000e+00 : f32
    %44 = arith.subf %cst_12, %37 : f32
    %c0_13 = arith.constant 0 : index
    %c0_14 = arith.constant 0 : index
    %45 = memref.load %arg3[%c0_13, %c0_14] : memref<1x2xf32, #tpu.memory_space<smem>>
    memref.store %44, %arg3[%c0_13, %c0_14] : memref<1x2xf32, #tpu.memory_space<smem>>
    %c0_15 = arith.constant 0 : index
    %c1 = arith.constant 1 : index
    %46 = memref.load %arg3[%c0_15, %c1] : memref<1x2xf32, #tpu.memory_space<smem>>
    memref.store %43, %arg3[%c0_15, %c1] : memref<1x2xf32, #tpu.memory_space<smem>>
    return
  }
  func.func @transform_0(%arg0: i32) -> (i32, i32) {
    %c0_i32 = arith.constant 0 : i32
    %c0_i32_0 = arith.constant 0 : i32
    return %arg0, %c0_i32 : i32, i32
  }
  func.func @transform_1(%arg0: i32) -> (i32, i32) {
    %c0_i32 = arith.constant 0 : i32
    %c0_i32_0 = arith.constant 0 : i32
    return %arg0, %c0_i32 : i32, i32
  }
  func.func @transform_2(%arg0: i32) -> (i32, i32) {
    %c0_i32 = arith.constant 0 : i32
    %c0_i32_0 = arith.constant 0 : i32
    return %arg0, %c0_i32 : i32, i32
  }
}

</mosaic_0001>

<bundles_post_ra>
// kernel: tpu_custom_call.1
= control target key start
LH: loop header
LB: loop body
LE: loop exit
PB: predicated region body
PF: predicated region fallthrough
CT: control target
= control target key end

     0   :  { %vm20_vm0 = vcmask 261120   ;;  %s151_s0 = inlined_call_operand.vmem [shape: f32[8,32], index: 0, kind: input, shape index: {}]   ;;  %s152_s1 = inlined_call_operand.vmem [shape: s32[8,1], index: 1, kind: input, shape index: {}]   ;;  %s153_s2 = inlined_call_operand.hbm [shape: f32[1,2], index: 2, kind: output, shape index: {}]  }
   0x1   :  { %v19_v0 = vld [vmem:[%s151_s0] sm:$0xff] }
   0x2   :  { %7 = vsyncpa [#allocation3], 0  ;;  %v21_v1 = vsel %vm20_vm0, %v19_v0, -inf  ;;  %v121_v2 = vmov 0   ;;  %v12_v3 = vld [vmem:[%s152_s1] sm:$0xff]  ;;  %v32_v9 = vlaneseq  ;;  %vm50_vm2 = vcmask 7168  }
   0x3   :  { %100 = vset.pattern.permute.xlu0 %v121_v2  ;;  %v122_v26 = vmov 0.0   ;;  %s83_s15 = sshll.u32 %s153_s2, 4  ;;  %s123_s17 = smov [#allocation2]   ;;  %s84_s15 = int_to_ptr.hbm [resolvable:$true] %s83_s15 }
   0x4   :  { %22 = vmax.xlane.f32.xlu0 %v21_v1  ;;  %v33_v10 = vand.u32 127, %v32_v9  ;;  %v63_v27 = vsel %vm50_vm2, 1.0, %v122_v26 }
  0x18   :  { %35 = vperm.xlu0 %100, %v12_v3  }
  0x77   :  { %v23_v4 = vpop.xlane.xlu0 %22 }
  0x78   :  { %v24_v5 = vsub.f32 %v19_v0, %v23_v4 }
  0x7a   :  { %v25_v6 = vmul.f32 1.442695, %v24_v5 }
  0x7c   :  { %101 = vpow2.f32 %v25_v6 }
  0x82   :  { %v102_v7 = vpop.eup %101 }
  0x83   :  { %v27_v8 = vsel %vm20_vm0, %v102_v7, 0.0 }
  0x84   :  { %28 = vadd.xlane.f32.xlu1 %v27_v8 }
  0x8a   :  { %v36_v11 = vpop.permute.xlu0 %35 }
  0x8b   :  { %vm37_vm1 = vcmp.eq.s32.totalorder %v33_v10, %v36_v11 }
  0x8c   :  { %v38_v12 = vsel %vm37_vm1, %v24_v5, 0.0 }
  0x8d   :  { %v39_v13 = vsel %vm20_vm0, %v38_v12, 0.0 }
  0x8e   :  { %40 = vadd.xlane.f32.xlu1 %v39_v13 }
  0xf7   :  { %v29_v14 = vpop.xlane.xlu1 %28 }
  0xf8   :  { %103 = vlog2.f32 %v29_v14 }
  0xfe   :  { %v104_v15 = vpop.eup %103 }
  0xff   :  { %v31_v16 = vmul.f32 0.6931472, %v104_v15 }
 0x101   :  { %v41_v17 = vpop.xlane.xlu1 %40 }
 0x102   :  { %v42_v18 = vsub.f32 %v41_v17, %v31_v16 }
 0x104   :  { %v43_v19 = vmul.f32 1.442695, %v42_v18 }
 0x106   :  { %105 = vpow2.f32 %v43_v19 }
 0x10c   :  { %v106_v20 = vpop.eup %105 }
 0x10d   :  { %v45_v21 = vsub.f32 1.0, %v106_v20 }
 0x10f   :  { %v46_v22 = vmax.f32 %v45_v21, 0.0 }
 0x111   :  { %v47_v23 = vmul.f32 %v46_v22, %v46_v22 }
 0x113   :  { %v48_v24 = vmul.f32 %v47_v23, %v42_v18 }
 0x115   :  { %v51_v25 = vsel %vm50_vm2, %v48_v24, 0.0 }
 0x116   :  { %52 = vadd.xlane.f32.xlu2 %v51_v25 }
 0x11e   :  { %64 = vadd.xlane.f32.xlu2 %v63_v27 }
 0x189   :  { %v53_v28 = vpop.xlane.xlu2 %52 }
 0x18a   :  { %v54_v29 = vrot.slane %v53_v28, 4 }
 0x18c   :  { %v55_v30 = vadd.f32 %v54_v29, %v53_v28 }
 0x18e   :  { %v56_v31 = vrot.slane %v55_v30, 2 }
 0x190   :  { %v57_v32 = vadd.f32 %v56_v31, %v55_v30 }
 0x191   :  { %v65_v33 = vpop.xlane.xlu2 %64 }
 0x192   :  { %v66_v34 = vrot.slane %v65_v33, 4  ;;  %v58_v35 = vrot.slane %v57_v32, 1 }
 0x194   :  { %v67_v36 = vadd.f32 %v66_v34, %v65_v33  ;;  %v59_v37 = vadd.f32 %v58_v35, %v57_v32 }
 0x196   :  { %v68_v38 = vrot.slane %v67_v36, 2  ;;  %93 = vpush %v59_v37 }
 0x198   :  { %v69_v39 = vadd.f32 %v68_v38, %v67_v36 }
 0x19a   :  { %v70_v40 = vrot.slane %v69_v39, 1 }
 0x19c   :  { %v71_v41 = vadd.f32 %v70_v40, %v69_v39 }
 0x19e   :  { %95 = vpush %v71_v41 }
 0x1c7   :  { %s94_s0 = spop %93 }
 0x1c8   :  { %s73_s1 = ssub.f32 0.0, %s94_s0 }
 0x1ca   :  { %75 = sst [smem:[#allocation2]] %s73_s1 }
 0x1cf   :  { %s96_s16 = spop %95 }
 0x1d0   :  { %77 = sst [smem:[#allocation2 + $0x1]] %s96_s16 }
 0x1d1   :  { %86 = dma.smem_to_hbm %s123_s17, 16, %s84_s15, [#allocation3]  }
 0x1d2   :  { %119 = dma.done.wait [#allocation3], 16  }
 0x1d3   :  { %120 = vsyncadd [#allocation3], 4294967280 }
 0x1d4   :  { %91 = sfence }
 0x1d5   :  { %92 = vsyncpa [#allocation3], 1 }

</bundles_post_ra>
